<compile_context>
chip_gen: v5e
topology: v5e:2x2
jax: 0.10.0
libtpu: 0.0.40
codegen_flags: <defaults>
</compile_context>

<pallas_src>
import functools

import jax
import jax.numpy as jnp
from jax import lax
from jax.experimental import pallas as pl
from jax.experimental.pallas import tpu as pltpu


def _mlp_kernel(x_ref, w1_ref, b1_ref, w2_ref, b2_ref, o_ref, *, x_feature_major):
    """One batch tile.  All compute is batch-on-lanes: (features, TILE_N)."""
    w1 = w1_ref[...]                                     # (D_H, D_IN)

    if x_feature_major:
        # x_ref: (D_IN, TILE_N) — already feature-major, plain matmul.
        h = jnp.dot(w1, x_ref[...], preferred_element_type=jnp.float32)
    else:
        # x_ref: (TILE_N, D_IN) — contract dim 1 of both operands.  The
        # feature-major relayout (if any) happens in VMEM under the input DMA
        # instead of as a separate HBM transpose pass in the wrapper.
        h = lax.dot_general(
            w1, x_ref[...],
            dimension_numbers=(((1,), (1,)), ((), ())),
            preferred_element_type=jnp.float32)          # (D_H, TILE_N)

    # Bias + ReLU.  b1 is (D_H, 1) and broadcasts over lanes.
    h = jnp.maximum(h + b1_ref[...], 0.0)

    # RMSNorm over the feature axis (= sublane axis 0 in this layout).
    # torch.nn.RMSNorm(eps=None) -> eps = finfo(dtype).eps.  The learned gain
    # is pre-folded into w2 on the host, so no multiply here.
    ms = jnp.mean(h * h, axis=0, keepdims=True)          # (1, TILE_N)
    h = h * lax.rsqrt(ms + jnp.finfo(jnp.float32).eps)

    # Linear(5 -> 2): (D_OUT, D_H) @ (D_H, TILE_N) -> (D_OUT, TILE_N), lane-dense.
    out = jnp.dot(w2_ref[...], h, preferred_element_type=jnp.float32) + b2_ref[...]
    o_ref[...] = out.astype(o_ref.dtype)


def _round_up(a, b):
    return ((a + b - 1) // b) * b


def mlp_forward_pallas(x, w1, b1, g, w2, b2, *,
                       x_feature_major=False,
                       out_feature_major=False,
                       tile_n=None):
    """Pallas forward pass.

    x: (N, D_IN) by default, or (D_IN, N) when x_feature_major=True.
    Returns (N, D_OUT) (PyTorch layout) unless out_feature_major=True, in
    which case the lane-dense (D_OUT, N) kernel output is returned as-is.
    """
    if x_feature_major:
        d_in, N = x.shape
    else:
        N, d_in = x.shape
    d_h = w1.shape[0]
    d_out = w2.shape[0]

    # Fold the RMSNorm gain into the second linear layer: w2' = w2 * g.
    w2_eff = w2 * g[None, :]
    b1_2d = b1.reshape(d_h, 1)
    b2_2d = b2.reshape(d_out, 1)

    # Batch tiling on the 128-wide lane axis:
    #  - small N: one full-extent block (always layout-legal),
    #  - large N: big 128-multiple tiles (per-step payload >> 0.35 us per-step
    #    overhead), capped so the grid keeps >= 4 steps for v7x's two TCs.
    #    Row-major x blocks lane-pad D_IN -> 128 in VMEM, so cap them smaller.
    if tile_n is None:
        if N <= 4096:
            tile_n = N
        else:
            max_tile = 32768 if x_feature_major else 16384
            tile_n = min(max_tile, _round_up(pl.cdiv(N, 4), 128))
    grid = (pl.cdiv(N, tile_n),)

    # Weights/biases are small and stay resident in VMEM across grid steps.
    resident = lambda a: pl.BlockSpec(a.shape, lambda i: (0, 0))

    if x_feature_major:
        x_spec = pl.BlockSpec((d_in, tile_n), lambda i: (0, i))
    else:
        x_spec = pl.BlockSpec((tile_n, d_in), lambda i: (i, 0))

    kernel = functools.partial(_mlp_kernel, x_feature_major=x_feature_major)

    out_fm = pl.pallas_call(
        kernel,
        out_shape=jax.ShapeDtypeStruct((d_out, N), x.dtype),
        grid=grid,
        in_specs=[
            x_spec,
            resident(w1),
            resident(b1_2d),
            resident(w2_eff),
            resident(b2_2d),
        ],
        out_specs=pl.BlockSpec((d_out, tile_n), lambda i: (0, i)),
        compiler_params=pltpu.CompilerParams(
            dimension_semantics=("parallel",),
            vmem_limit_bytes=40 * 1024 * 1024,
        ),
    )(x, w1, b1_2d, w2_eff, b2_2d)

    if out_feature_major:
        return out_fm                     # (D_OUT, N), lane-dense
    return out_fm.T                       # PyTorch layout (N, D_OUT)


def my_model_forward(x, w1, b1, g, w2, b2):
    """MyModel.forward.  Small batches skip Pallas (launch overhead dominates
    and XLA fuses this tiny MLP trivially); larger batches use the tiled
    Pallas kernel."""
    N = x.shape[0]
    if N < 1024:
        h = jnp.maximum(x @ w1.T + b1, 0.0)
        h = h * lax.rsqrt(jnp.mean(h * h, axis=-1, keepdims=True)
                          + jnp.finfo(jnp.float32).eps) * g
        return h @ w2.T + b2
    return mlp_forward_pallas(x, w1, b1, g, w2, b2)


def _mlp_reference(x, w1, b1, g, w2, b2):
    """Plain-JAX reference matching PyTorch semantics (full-precision dots)."""
    hp = lax.Precision.HIGHEST
    h = jnp.maximum(jnp.einsum("nd,hd->nh", x, w1, precision=hp) + b1, 0.0)
    h = h * lax.rsqrt(jnp.mean(h * h, axis=-1, keepdims=True)
                      + jnp.finfo(jnp.float32).eps) * g
    return jnp.einsum("nh,oh->no", h, w2, precision=hp) + b2


if __name__ == "__main__":
    key = jax.random.PRNGKey(0)
    k_x, k_x2, k_w1, k_b1, k_w2, k_b2 = jax.random.split(key, 6)

    N, D_IN, D_H, D_OUT = 32, 10, 5, 2
    x = jax.random.normal(k_x, (N, D_IN), dtype=jnp.float32)

    # Deterministic PyTorch-style init: uniform(-1/sqrt(fan_in), 1/sqrt(fan_in)).
    lim1 = 1.0 / D_IN ** 0.5
    w1 = jax.random.uniform(k_w1, (D_H, D_IN), minval=-lim1, maxval=lim1, dtype=jnp.float32)
    b1 = jax.random.uniform(k_b1, (D_H,), minval=-lim1, maxval=lim1, dtype=jnp.float32)
    g = jnp.ones((D_H,), dtype=jnp.float32)      # RMSNorm weight init = ones
    lim2 = 1.0 / D_H ** 0.5
    w2 = jax.random.uniform(k_w2, (D_OUT, D_H), minval=-lim2, maxval=lim2, dtype=jnp.float32)
    b2 = jax.random.uniform(k_b2, (D_OUT,), minval=-lim2, maxval=lim2, dtype=jnp.float32)

    # 1) Pallas kernel at the spec's batch size (grid == 1, full-extent block).
    out_small = mlp_forward_pallas(x, w1, b1, g, w2, b2)
    jax.block_until_ready(out_small)
    ref_small = _mlp_reference(x, w1, b1, g, w2, b2)
    assert out_small.shape == (N, D_OUT)
    assert jnp.allclose(out_small, ref_small, atol=1e-4, rtol=1e-4)

    # 2) Tiled path: multiple grid steps over the batch, row-major x in HBM
    #    (no host-side transpose).  Small tile override forces grid > 1.
    N2 = 1024
    x2 = jax.random.normal(k_x2, (N2, D_IN), dtype=jnp.float32)
    ref2 = _mlp_reference(x2, w1, b1, g, w2, b2)
    out_tiled = mlp_forward_pallas(x2, w1, b1, g, w2, b2, tile_n=256)
    jax.block_until_ready(out_tiled)
    assert out_tiled.shape == (N2, D_OUT)
    assert jnp.allclose(out_tiled, ref2, atol=1e-4, rtol=1e-4)

    # 3) Feature-major producer path: no transpose anywhere, lane-dense in/out.
    out_fm = mlp_forward_pallas(x2.T, w1, b1, g, w2, b2,
                                x_feature_major=True, out_feature_major=True,
                                tile_n=256)
    jax.block_until_ready(out_fm)
    assert out_fm.shape == (D_OUT, N2)
    assert jnp.allclose(out_fm, ref2.T, atol=1e-4, rtol=1e-4)

    # 4) Dispatcher: small N goes through the fused XLA fast path.
    out_disp = my_model_forward(x, w1, b1, g, w2, b2)
    jax.block_until_ready(out_disp)
    assert jnp.allclose(out_disp, ref_small, atol=1e-4, rtol=1e-4)

    print("KERNEL_OK")
</pallas_src>

<mosaic_0001>
module attributes {stable_mosaic.version = 11 : i64} {
  func.func @_mlp_kernel(%arg0: i32, %arg1: memref<32x10xf32, #tpu.memory_space<vmem>>, %arg2: memref<5x10xf32, #tpu.memory_space<vmem>>, %arg3: memref<5x1xf32, #tpu.memory_space<vmem>>, %arg4: memref<2x5xf32, #tpu.memory_space<vmem>>, %arg5: memref<2x1xf32, #tpu.memory_space<vmem>>, %arg6: memref<2x32xf32, #tpu.memory_space<vmem>>) attributes {dimension_semantics = [#tpu.dimension_semantics<parallel>], iteration_bounds = array<i64: 1>, scalar_prefetch = 0 : i64, scratch_operands = 0 : i64, tpu.core_type = #tpu.core_type<tc>, window_params = [{transform_indices = @transform_0, window_bounds = array<i64: 32, 10>}, {pipeline_mode = #tpu.pipeline_mode<synchronous>, transform_indices = @transform_1, window_bounds = array<i64: 5, 10>}, {pipeline_mode = #tpu.pipeline_mode<synchronous>, transform_indices = @transform_2, window_bounds = array<i64: 5, 1>}, {pipeline_mode = #tpu.pipeline_mode<synchronous>, transform_indices = @transform_3, window_bounds = array<i64: 2, 5>}, {pipeline_mode = #tpu.pipeline_mode<synchronous>, transform_indices = @transform_4, window_bounds = array<i64: 2, 1>}, {transform_indices = @transform_5, window_bounds = array<i64: 2, 32>}]} {
    %c0 = arith.constant 0 : index
    %c0_0 = arith.constant 0 : index
    %0 = vector.load %arg2[%c0, %c0_0] : memref<5x10xf32, #tpu.memory_space<vmem>>, vector<5x10xf32>
    %c0_1 = arith.constant 0 : index
    %c0_2 = arith.constant 0 : index
    %1 = vector.load %arg1[%c0_1, %c0_2] : memref<32x10xf32, #tpu.memory_space<vmem>>, vector<32x10xf32>
    %cst = arith.constant dense<0.000000e+00> : vector<5x32xf32>
    %2 = tpu.matmul %0, %1, %cst {dimension_numbers = #tpu.dot_dimension_numbers<[1], [1], [0], [0], [0, 0, 1, 0], [], []>} : vector<5x10xf32>, vector<32x10xf32>, vector<5x32xf32> -> vector<5x32xf32>
    %c0_3 = arith.constant 0 : index
    %c0_4 = arith.constant 0 : index
    %3 = vector.load %arg3[%c0_3, %c0_4] : memref<5x1xf32, #tpu.memory_space<vmem>>, vector<5x1xf32>
    %4 = vector.broadcast %3 : vector<5x1xf32> to vector<5x32xf32>
    %5 = arith.addf %2, %4 : vector<5x32xf32>
    %cst_5 = arith.constant 0.000000e+00 : f32
    %6 = vector.broadcast %cst_5 : f32 to vector<5x32xf32>
    %7 = arith.maximumf %5, %6 : vector<5x32xf32>
    %8 = arith.mulf %7, %7 : vector<5x32xf32>
    %cst_6 = arith.constant dense<0.000000e+00> : vector<32xf32>
    %9 = vector.multi_reduction <add>, %8, %cst_6 [0] : vector<5x32xf32> to vector<32xf32>
    %10 = vector.shape_cast %9 : vector<32xf32> to vector<1x32xf32>
    %cst_7 = arith.constant 5.000000e+00 : f32
    %11 = vector.broadcast %cst_7 : f32 to vector<1x32xf32>
    %12 = arith.divf %10, %11 : vector<1x32xf32>
    %cst_8 = arith.constant 1.1920929E-7 : f32
    %13 = vector.broadcast %cst_8 : f32 to vector<1x32xf32>
    %14 = arith.addf %12, %13 : vector<1x32xf32>
    %15 = math.rsqrt %14 : vector<1x32xf32>
    %16 = vector.broadcast %15 : vector<1x32xf32> to vector<5x32xf32>
    %17 = arith.mulf %7, %16 : vector<5x32xf32>
    %c0_9 = arith.constant 0 : index
    %c0_10 = arith.constant 0 : index
    %18 = vector.load %arg4[%c0_9, %c0_10] : memref<2x5xf32, #tpu.memory_space<vmem>>, vector<2x5xf32>
    %cst_11 = arith.constant dense<0.000000e+00> : vector<2x32xf32>
    %19 = tpu.matmul %18, %17, %cst_11 {dimension_numbers = #tpu.dot_dimension_numbers<[1], [0], [0], [1], [0, 0, 1, 1], [], []>} : vector<2x5xf32>, vector<5x32xf32>, vector<2x32xf32> -> vector<2x32xf32>
    %c0_12 = arith.constant 0 : index
    %c0_13 = arith.constant 0 : index
    %20 = vector.load %arg5[%c0_12, %c0_13] : memref<2x1xf32, #tpu.memory_space<vmem>>, vector<2x1xf32>
    %21 = vector.broadcast %20 : vector<2x1xf32> to vector<2x32xf32>
    %22 = arith.addf %19, %21 : vector<2x32xf32>
    %c0_14 = arith.constant 0 : index
    %c0_15 = arith.constant 0 : index
    %23 = vector.load %arg6[%c0_14, %c0_15] : memref<2x32xf32, #tpu.memory_space<vmem>>, vector<2x32xf32>
    tpu.vector_store %arg6[%c0_14, %c0_15], %22 {strides = array<i32>} : memref<2x32xf32, #tpu.memory_space<vmem>>, vector<2x32xf32>,
    return
  }
  func.func @transform_0(%arg0: i32) -> (i32, i32) {
    %c0_i32 = arith.constant 0 : i32
    %c0_i32_0 = arith.constant 0 : i32
    return %arg0, %c0_i32 : i32, i32
  }
  func.func @transform_1(%arg0: i32) -> (i32, i32) {
    %c0_i32 = arith.constant 0 : i32
    %c0_i32_0 = arith.constant 0 : i32
    %c0_i32_1 = arith.constant 0 : i32
    return %c0_i32, %c0_i32_0 : i32, i32
  }
  func.func @transform_2(%arg0: i32) -> (i32, i32) {
    %c0_i32 = arith.constant 0 : i32
    %c0_i32_0 = arith.constant 0 : i32
    %c0_i32_1 = arith.constant 0 : i32
    return %c0_i32, %c0_i32_0 : i32, i32
  }
  func.func @transform_3(%arg0: i32) -> (i32, i32) {
    %c0_i32 = arith.constant 0 : i32
    %c0_i32_0 = arith.constant 0 : i32
    %c0_i32_1 = arith.constant 0 : i32
    return %c0_i32, %c0_i32_0 : i32, i32
  }
  func.func @transform_4(%arg0: i32) -> (i32, i32) {
    %c0_i32 = arith.constant 0 : i32
    %c0_i32_0 = arith.constant 0 : i32
    %c0_i32_1 = arith.constant 0 : i32
    return %c0_i32, %c0_i32_0 : i32, i32
  }
  func.func @transform_5(%arg0: i32) -> (i32, i32) {
    %c0_i32 = arith.constant 0 : i32
    %c0_i32_0 = arith.constant 0 : i32
    return %c0_i32, %arg0 : i32, i32
  }
}

</mosaic_0001>

<bundles_post_ra>
// kernel: tpu_custom_call.1
= control target key start
LH: loop header
LB: loop body
LE: loop exit
PB: predicated region body
PF: predicated region fallthrough
CT: control target
= control target key end

     0   :  { %vm32_vm0 = vcmask 80896   ;;  %v192_v1 = vmov 0   ;;  %s257_s0 = inlined_call_operand.vmem [shape: f32[32,10], index: 0, kind: input, shape index: {}]   ;;  %s258_s1 = inlined_call_operand.vmem [shape: f32[5,10], index: 1, kind: input, shape index: {}]   ;;  %s259_s2 = inlined_call_operand.vmem [shape: f32[5,1], index: 2, kind: input, shape index: {}]   ;;  %s260_s3 = inlined_call_operand.vmem [shape: f32[2,5], index: 3, kind: input, shape index: {}]   ;;  %s261_s4 = inlined_call_operand.vmem [shape: f32[2,1], index: 4, kind: input, shape index: {}]   ;;  %s262_s5 = inlined_call_operand.hbm [shape: f32[2,32], index: 5, kind: output, shape index: {}]  }
   0x1   :  { %v25_v0 = vld [vmem:[%s257_s0 + $0x18] sm:$0xff]  ;;  %161 = vset.pattern.permute.xlu0 %v192_v1  ;;  %v26_v2 = vld [vmem:[%s259_s2] sm:$0x1f]  ;;  %v24_v3 = vld [vmem:[%s257_s0 + $0x10] sm:$0xff] }
   0x2   :  { %151 = vmatpush.xpose.msk.msra.mxu0 %vm32_vm0, %v25_v0  ;;  %29 = vperm.xlu0 %161, %v26_v2  }
   0x3   :  { %10 = vsyncpa [#allocation3], 0  ;;  %v23_v4 = vld [vmem:[%s257_s0 + $0x8] sm:$0xff]  ;;  %v99_v5 = vld [vmem:[%s261_s4] sm:$0x3]  ;;  %v193_v8 = vmov 5.0  }
   0x4   :  { %v22_v6 = vld [vmem:[%s257_s0] sm:$0xff]  ;;  %162 = vrcp.f32 %v193_v8  ;;  %vm70_vm1 = vcmask 258048   ;;  %vm109_vm6 = vcmask 1044480   ;;  %vm105_vm7 = vcmask 39936   ;;  %s194_s4 = smov [#allocation2]   ;;  %s142_s9 = sshll.u32 %s262_s5, 4  ;;  %s143_s9 = int_to_ptr.hbm [resolvable:$true] %s142_s9 }
   0x5   :  { %v21_v7 = vld [vmem:[%s258_s1] sm:$0x1f]  ;;  %s140_s6 = sshll.u32 %s194_s4, 4  ;;  %vm133_vm8 = vcmask 254976   ;;  %s141_s6 = int_to_ptr.vmem [resolvable:$true] %s140_s6 }
   0x6   :  { %152 = vmatpush.xpose.msk.msra.mxu0 %vm32_vm0, %v24_v3  ;;  %v98_v37 = vld [vmem:[%s260_s3] sm:$0x3] }
   0xa   :  { %153 = vmatpush.xpose.msk.msra.mxu0 %vm32_vm0, %v23_v4  ;;  %102 = vperm.xlu0 %161, %v99_v5   ;;  %v163_v9 = vpop.eup %162 }
   0xb   :  { %v79_v13 = vmul.f32 5.0, %v163_v9  ;;  %vm83_vm2 = vweird.f32 %v163_v9 }
   0xd   :  { %v80_v16 = vsub.f32 1.0, %v79_v13 }
   0xe   :  { %154 = vmatpush.xpose.msk.msra.mxu0 %vm32_vm0, %v22_v6 }
   0xf   :  { %v81_v19 = vmul.f32 %v163_v9, %v80_v16 }
  0x11   :  { %155 = vmatmul.msk.f32.vlgmr.msra.gmra.mxu0 %vm32_vm0, %v21_v7  ;;  %v82_v22 = vadd.f32 %v163_v9, %v81_v19 }
  0x13   :  { %v84_v25 = vsel %vm83_vm2, %v163_v9, %v82_v22 }
  0x74   :  { %v30_v10 = vpop.permute.xlu0 %29 }
  0x7c   :  { %v103_v38 = vpop.permute.xlu0 %102 }
  0x8e   :  { %v65_v11 = vpop.f32.mrf.mxu0 }
  0x8f   :  { %v66_v12 = vadd.f32 %v65_v11, %v30_v10 }
  0x91   :  { %v68_v14 = vmax.f32 %v66_v12, 0.0 }
  0x93   :  { %v69_v15 = vmul.f32 %v68_v14, %v68_v14 }
  0x95   :  { %v71_v17 = vsel %vm70_vm1, %v69_v15, 0.0 }
  0x96   :  { %v72_v18 = vrot.slane %v71_v17, 4 }
  0x98   :  { %v73_v20 = vadd.f32 %v72_v18, %v71_v17 }
  0x9a   :  { %v74_v21 = vrot.slane %v73_v20, 2 }
  0x9c   :  { %v75_v23 = vadd.f32 %v74_v21, %v73_v20 }
  0x9e   :  { %v76_v24 = vrot.slane %v75_v23, 1 }
  0xa0   :  { %v77_v26 = vadd.f32 %v76_v24, %v75_v23 }
  0xa2   :  { %v85_v27 = vmul.f32 %v84_v25, %v77_v26 }
  0xa4   :  { %v86_v28 = vadd.f32 1.1920929e-07, %v85_v27 }
  0xa6   :  { %164 = vrsqrt.f32 %v86_v28  ;;  %vm93_vm4 = vweird.f32 %v86_v28 }
  0xac   :  { %v165_v29 = vpop.eup %164 }
  0xad   :  { %v88_v30 = vmul.f32 %v165_v29, %v86_v28  ;;  %vm94_vm3 = vweird.f32 %v165_v29 }
  0xae   :  { %vm95_vm5 = vmor %vm93_vm4, %vm94_vm3 }
  0xaf   :  { %v89_v31 = vmul.f32 %v165_v29, %v88_v30 }
  0xb1   :  { %v90_v32 = vmul.f32 0.5, %v89_v31 }
  0xb3   :  { %v91_v33 = vsub.f32 1.5, %v90_v32 }
  0xb5   :  { %v92_v34 = vmul.f32 %v165_v29, %v91_v33 }
  0xb7   :  { %v96_v35 = vsel %vm95_vm5, %v165_v29, %v92_v34 }
  0xb8   :  { %v97_v36 = vmul.f32 %v96_v35, %v68_v14 }
  0xba   :  { %156 = vmatpush.msk.msra.mxu1 %vm109_vm6, %v97_v36 }
  0xbb   :  { %157 = vmatmul.msk.f32.vlgmr.msra.gmra.mxu1 %vm105_vm7, %v98_v37 }
 0x138   :  { %v130_v39 = vpop.f32.mrf.mxu1 }
 0x139   :  { %v131_v40 = vadd.f32 %v130_v39, %v103_v38 }
 0x13b   :  { %134 = vst.msk [vmem:[#allocation2] sm:$0x3] %vm133_vm8, %v131_v40 }
 0x13c   :  { %145 = dma.vmem_to_hbm [thread:$0]  %s141_s6, 32, %s143_s9, [#allocation3]  }
 0x13d   :  { %190 = dma.done.wait [#allocation3], 32  }
 0x13e   :  { %191 = vsyncadd [#allocation3], 4294967264 }
 0x13f   :  { %150 = vsyncpa [#allocation3], 1 }

</bundles_post_ra>
